<compile_context>
chip_gen: v5e
topology: v5e:2x2
jax: 0.10.0
libtpu: 0.0.40
codegen_flags: <defaults>
</compile_context>

<pallas_src>
import functools

import jax
import jax.numpy as jnp
from jax import lax
from jax.experimental import pallas as pl
from jax.experimental.pallas import tpu as pltpu


def _round_up(x, m):
    return (x + m - 1) // m * m


def _pinn_fused_kernel(x_ref, *refs, n_layers, inv_std, shift, compute_dtype):
    """Fused MLP: refs = (w1, b1, ..., wL, bL, out_ref).

    x_ref is batch-major (tb, in0); weights are (out_i, in_i) in compute_dtype;
    biases are (out_i, 1) f32; out_ref is feature-major (out_L, tb) so the
    batch lives on the 128-lane axis for every layer after the first dot.
    """
    out_ref = refs[-1]
    # Fused normalization: (x - mean) / std  ==  x * inv_std + shift  (f32).
    h = x_ref[...] * inv_std + shift            # (tb, in0)
    h = h.astype(compute_dtype)
    for i in range(n_layers):
        w = refs[2 * i][...]                    # (out_i, in_i), compute_dtype
        b = refs[2 * i + 1][...]                # (out_i, 1), f32
        if i == 0:
            # Contract on in0 of the batch-major block -> (out_0, tb).
            # This keeps activations feature-major without any wrapper
            # transpose of x.
            h = lax.dot_general(
                w, h,
                dimension_numbers=(((1,), (1,)), ((), ())),
                preferred_element_type=jnp.float32)
        else:
            h = jnp.dot(w, h, preferred_element_type=jnp.float32)
        h = h + b                               # f32 accumulator + f32 bias
        if i != n_layers - 1:
            h = jnp.tanh(h.astype(compute_dtype))
    out_ref[...] = h.astype(out_ref.dtype)


def pinn_forward(x, params, mean=0.0, std=1.0, tb_max=4096,
                 compute_dtype=jnp.bfloat16):
    """Forward pass of the PINN.  x: (B, in_features) f32 -> (B, out_features) f32."""
    B, in_f = x.shape
    n_layers = len(params)
    out_f = params[-1][0].shape[0]

    # ---- batch tile selection -------------------------------------------
    # Multiple of 128 (lane width).  Aim for >= 2 grid steps (megacore on
    # v7x) while keeping the tile big enough to amortize per-step overhead.
    B_128 = _round_up(B, 128)
    tb = min(tb_max, _round_up(pl.cdiv(B_128, 2), 128))
    grid = pl.cdiv(B, tb)
    B_pad = grid * tb

    inv_std = 1.0 / float(std)
    shift = -float(mean) * inv_std

    kernel = functools.partial(
        _pinn_fused_kernel,
        n_layers=n_layers,
        inv_std=inv_std,
        shift=shift,
        compute_dtype=compute_dtype,
    )

    # Input stays batch-major: no wrapper-side transpose/pad HBM pass.
    in_specs = [pl.BlockSpec((tb, in_f), lambda i: (i, 0))]
    flat_params = []
    for w, b in params:
        w = w.astype(compute_dtype)             # cast once, outside the kernel
        in_specs.append(pl.BlockSpec(w.shape, lambda i: (0, 0)))  # VMEM-resident
        in_specs.append(pl.BlockSpec(b.shape, lambda i: (0, 0)))
        flat_params += [w, b]

    out = pl.pallas_call(
        kernel,
        out_shape=jax.ShapeDtypeStruct((out_f, B_pad), jnp.float32),
        grid=(grid,),
        in_specs=in_specs,
        out_specs=pl.BlockSpec((out_f, tb), lambda i: (0, i)),
        compiler_params=pltpu.CompilerParams(
            dimension_semantics=("parallel",),
        ),
    )(x, *flat_params)

    return out[:, :B].T                         # back to batch-major (B, out_f)


def init_pinn_params(sizes, seed=0, gain=5.0 / 3.0):
    """Deterministic Xavier-normal weights (tanh gain), zero biases.

    Weights in the PyTorch (out_features, in_features) layout; biases are
    (out_features, 1) for lane-broadcast in the feature-major kernel.
    """
    params = []
    n_layers = len(sizes) - 1
    for i in range(n_layers):
        in_f, out_f = sizes[i], sizes[i + 1]
        w_std = gain * jnp.sqrt(2.0 / (in_f + out_f))
        key = jax.random.fold_in(jax.random.PRNGKey(seed), i)
        w = jax.random.normal(key, (out_f, in_f), dtype=jnp.float32) * w_std
        b = jnp.zeros((out_f, 1), dtype=jnp.float32)
        params.append((w, b))
    return params


def pinn_forward_ref(x, params, mean=0.0, std=1.0):
    """Pure-JAX f32 reference for correctness checking."""
    h = (x - mean) / std
    n_layers = len(params)
    for i, (w, b) in enumerate(params):
        h = h @ w.T + b.T
        if i != n_layers - 1:
            h = jnp.tanh(h)
    return h


if __name__ == "__main__":
    sizes = [2, 32, 32, 1]        # typical PINN: (x, t) -> u
    mean, std = 0.5, 2.0
    params = init_pinn_params(sizes, seed=0)

    key = jax.random.PRNGKey(0)

    # ---- strict f32 checks (exact-path correctness, incl. ragged grid) ----
    for batch in (8, 300):        # 300 -> 2 grid steps + padded last block
        x = jax.random.normal(jax.random.fold_in(key, batch),
                              (batch, sizes[0]), dtype=jnp.float32)
        out = pinn_forward(x, params, mean=mean, std=std,
                           compute_dtype=jnp.float32)
        out = jax.block_until_ready(out)
        ref = pinn_forward_ref(x, params, mean=mean, std=std)
        assert out.shape == (batch, sizes[-1])
        assert jnp.allclose(out, ref, atol=1e-5, rtol=1e-5), "f32 path mismatch"

    # ---- default bf16 compute path (looser tolerance) ----------------------
    batch = 300
    x = jax.random.normal(jax.random.fold_in(key, 1), (batch, sizes[0]),
                          dtype=jnp.float32)
    out_bf16 = pinn_forward(x, params, mean=mean, std=std)   # bf16 default
    out_bf16 = jax.block_until_ready(out_bf16)
    ref = pinn_forward_ref(x, params, mean=mean, std=std)
    assert out_bf16.shape == (batch, sizes[-1])
    assert jnp.allclose(out_bf16, ref, atol=5e-2, rtol=5e-2), "bf16 path mismatch"

    print("KERNEL_OK")
</pallas_src>

<mosaic_0001>
module attributes {stable_mosaic.version = 11 : i64} {
  func.func @_pinn_fused_kernel(%arg0: i32, %arg1: memref<128x2xf32, #tpu.memory_space<vmem>>, %arg2: memref<32x2xf32, #tpu.memory_space<vmem>>, %arg3: memref<32x1xf32, #tpu.memory_space<vmem>>, %arg4: memref<32x32xf32, #tpu.memory_space<vmem>>, %arg5: memref<32x1xf32, #tpu.memory_space<vmem>>, %arg6: memref<1x32xf32, #tpu.memory_space<vmem>>, %arg7: memref<1x1xf32, #tpu.memory_space<vmem>>, %arg8: memref<1x128xf32, #tpu.memory_space<vmem>>) attributes {dimension_semantics = [#tpu.dimension_semantics<parallel>], iteration_bounds = array<i64: 1>, scalar_prefetch = 0 : i64, scratch_operands = 0 : i64, tpu.core_type = #tpu.core_type<tc>, window_params = [{transform_indices = @transform_0, window_bounds = array<i64: 128, 2>}, {pipeline_mode = #tpu.pipeline_mode<synchronous>, transform_indices = @transform_1, window_bounds = array<i64: 32, 2>}, {pipeline_mode = #tpu.pipeline_mode<synchronous>, transform_indices = @transform_2, window_bounds = array<i64: 32, 1>}, {pipeline_mode = #tpu.pipeline_mode<synchronous>, transform_indices = @transform_3, window_bounds = array<i64: 32, 32>}, {pipeline_mode = #tpu.pipeline_mode<synchronous>, transform_indices = @transform_4, window_bounds = array<i64: 32, 1>}, {pipeline_mode = #tpu.pipeline_mode<synchronous>, transform_indices = @transform_5, window_bounds = array<i64: 1, 32>}, {pipeline_mode = #tpu.pipeline_mode<synchronous>, transform_indices = @transform_6, window_bounds = array<i64: 1, 1>}, {transform_indices = @transform_7, window_bounds = array<i64: 1, 128>}]} {
    %c0 = arith.constant 0 : index
    %c0_0 = arith.constant 0 : index
    %0 = vector.load %arg1[%c0, %c0_0] : memref<128x2xf32, #tpu.memory_space<vmem>>, vector<128x2xf32>
    %cst = arith.constant 5.000000e-01 : f32
    %1 = vector.broadcast %cst : f32 to vector<128x2xf32>
    %2 = arith.mulf %0, %1 : vector<128x2xf32>
    %cst_1 = arith.constant -2.500000e-01 : f32
    %3 = vector.broadcast %cst_1 : f32 to vector<128x2xf32>
    %4 = arith.addf %2, %3 : vector<128x2xf32>
    %c0_2 = arith.constant 0 : index
    %c0_3 = arith.constant 0 : index
    %5 = vector.load %arg2[%c0_2, %c0_3] : memref<32x2xf32, #tpu.memory_space<vmem>>, vector<32x2xf32>
    %c0_4 = arith.constant 0 : index
    %c0_5 = arith.constant 0 : index
    %6 = vector.load %arg3[%c0_4, %c0_5] : memref<32x1xf32, #tpu.memory_space<vmem>>, vector<32x1xf32>
    %cst_6 = arith.constant dense<0.000000e+00> : vector<32x128xf32>
    %7 = tpu.matmul %5, %4, %cst_6 {dimension_numbers = #tpu.dot_dimension_numbers<[1], [1], [0], [0], [0, 0, 1, 0], [], []>} : vector<32x2xf32>, vector<128x2xf32>, vector<32x128xf32> -> vector<32x128xf32>
    %8 = vector.broadcast %6 : vector<32x1xf32> to vector<32x128xf32>
    %9 = arith.addf %7, %8 : vector<32x128xf32>
    %10 = math.tanh %9 : vector<32x128xf32>
    %c0_7 = arith.constant 0 : index
    %c0_8 = arith.constant 0 : index
    %11 = vector.load %arg4[%c0_7, %c0_8] : memref<32x32xf32, #tpu.memory_space<vmem>>, vector<32x32xf32>
    %c0_9 = arith.constant 0 : index
    %c0_10 = arith.constant 0 : index
    %12 = vector.load %arg5[%c0_9, %c0_10] : memref<32x1xf32, #tpu.memory_space<vmem>>, vector<32x1xf32>
    %cst_11 = arith.constant dense<0.000000e+00> : vector<32x128xf32>
    %13 = tpu.matmul %11, %10, %cst_11 {dimension_numbers = #tpu.dot_dimension_numbers<[1], [0], [0], [1], [0, 0, 1, 1], [], []>} : vector<32x32xf32>, vector<32x128xf32>, vector<32x128xf32> -> vector<32x128xf32>
    %14 = vector.broadcast %12 : vector<32x1xf32> to vector<32x128xf32>
    %15 = arith.addf %13, %14 : vector<32x128xf32>
    %16 = math.tanh %15 : vector<32x128xf32>
    %c0_12 = arith.constant 0 : index
    %c0_13 = arith.constant 0 : index
    %17 = vector.load %arg6[%c0_12, %c0_13] : memref<1x32xf32, #tpu.memory_space<vmem>>, vector<1x32xf32>
    %c0_14 = arith.constant 0 : index
    %c0_15 = arith.constant 0 : index
    %18 = vector.load %arg7[%c0_14, %c0_15] : memref<1x1xf32, #tpu.memory_space<vmem>>, vector<1x1xf32>
    %cst_16 = arith.constant dense<0.000000e+00> : vector<1x128xf32>
    %19 = tpu.matmul %17, %16, %cst_16 {dimension_numbers = #tpu.dot_dimension_numbers<[1], [0], [0], [1], [0, 0, 1, 1], [], []>} : vector<1x32xf32>, vector<32x128xf32>, vector<1x128xf32> -> vector<1x128xf32>
    %20 = vector.broadcast %18 : vector<1x1xf32> to vector<1x128xf32>
    %21 = arith.addf %19, %20 : vector<1x128xf32>
    %c0_17 = arith.constant 0 : index
    %c0_18 = arith.constant 0 : index
    %22 = vector.load %arg8[%c0_17, %c0_18] : memref<1x128xf32, #tpu.memory_space<vmem>>, vector<1x128xf32>
    tpu.vector_store %arg8[%c0_17, %c0_18], %21 {strides = array<i32>} : memref<1x128xf32, #tpu.memory_space<vmem>>, vector<1x128xf32>,
    return
  }
  func.func @transform_0(%arg0: i32) -> (i32, i32) {
    %c0_i32 = arith.constant 0 : i32
    %c0_i32_0 = arith.constant 0 : i32
    return %arg0, %c0_i32 : i32, i32
  }
  func.func @transform_1(%arg0: i32) -> (i32, i32) {
    %c0_i32 = arith.constant 0 : i32
    %c0_i32_0 = arith.constant 0 : i32
    %c0_i32_1 = arith.constant 0 : i32
    return %c0_i32, %c0_i32_0 : i32, i32
  }
  func.func @transform_2(%arg0: i32) -> (i32, i32) {
    %c0_i32 = arith.constant 0 : i32
    %c0_i32_0 = arith.constant 0 : i32
    %c0_i32_1 = arith.constant 0 : i32
    return %c0_i32, %c0_i32_0 : i32, i32
  }
  func.func @transform_3(%arg0: i32) -> (i32, i32) {
    %c0_i32 = arith.constant 0 : i32
    %c0_i32_0 = arith.constant 0 : i32
    %c0_i32_1 = arith.constant 0 : i32
    return %c0_i32, %c0_i32_0 : i32, i32
  }
  func.func @transform_4(%arg0: i32) -> (i32, i32) {
    %c0_i32 = arith.constant 0 : i32
    %c0_i32_0 = arith.constant 0 : i32
    %c0_i32_1 = arith.constant 0 : i32
    return %c0_i32, %c0_i32_0 : i32, i32
  }
  func.func @transform_5(%arg0: i32) -> (i32, i32) {
    %c0_i32 = arith.constant 0 : i32
    %c0_i32_0 = arith.constant 0 : i32
    %c0_i32_1 = arith.constant 0 : i32
    return %c0_i32, %c0_i32_0 : i32, i32
  }
  func.func @transform_6(%arg0: i32) -> (i32, i32) {
    %c0_i32 = arith.constant 0 : i32
    %c0_i32_0 = arith.constant 0 : i32
    %c0_i32_1 = arith.constant 0 : i32
    return %c0_i32, %c0_i32_0 : i32, i32
  }
  func.func @transform_7(%arg0: i32) -> (i32, i32) {
    %c0_i32 = arith.constant 0 : i32
    %c0_i32_0 = arith.constant 0 : i32
    return %c0_i32, %arg0 : i32, i32
  }
}

</mosaic_0001>

<bundles_post_ra>
// kernel: tpu_custom_call.1
= control target key start
LH: loop header
LB: loop body
LE: loop exit
PB: predicated region body
PF: predicated region fallthrough
CT: control target
= control target key end

     0   :  { %s597_s0 = inlined_call_operand.vmem [shape: f32[8,2], index: 0, kind: input, shape index: {}]   ;;  %s598_s1 = inlined_call_operand.vmem [shape: f32[32,2], index: 1, kind: input, shape index: {}]   ;;  %s599_s2 = inlined_call_operand.vmem [shape: f32[32,1], index: 2, kind: input, shape index: {}]   ;;  %s600_s3 = inlined_call_operand.vmem [shape: f32[32,32], index: 3, kind: input, shape index: {}]   ;;  %s601_s4 = inlined_call_operand.vmem [shape: f32[32,1], index: 4, kind: input, shape index: {}]   ;;  %s602_s5 = inlined_call_operand.vmem [shape: f32[1,32], index: 5, kind: input, shape index: {}]   ;;  %s603_s6 = inlined_call_operand.<no memory space> [shape: f32[1,1], index: 6, kind: input, shape index: {}]   ;;  %s604_s7 = inlined_call_operand.hbm [shape: f32[1,128], index: 7, kind: output, shape index: {}]  }
   0x1   :  { %v12_v0 = vstv %s603_s6 }
   0x2   :  { %13 = vst [vmem:[#allocation2] sm:$0x1] %v12_v0 }
   0x3   :  { %v44_v1 = vld [vmem:[%s597_s0 + $0x78] sm:$0xff]  ;;  %v43_v2 = vld [vmem:[%s597_s0 + $0x70] sm:$0xff]  ;;  %vm105_vm0 = vcmask 15360   ;;  %v42_v5 = vld [vmem:[%s597_s0 + $0x68] sm:$0xff] }
   0x4   :  { %v60_v3 = vmul.f32 0.5, %v44_v1  ;;  %v59_v4 = vmul.f32 0.5, %v43_v2 }
   0x6   :  { %v76_v6 = vadd.f32 -0.25, %v60_v3 }
   0x7   :  { %14 = vsyncpa [#allocation4], 0  ;;  %v75_v7 = vadd.f32 -0.25, %v59_v4  ;;  %v58_v8 = vmul.f32 0.5, %v42_v5  ;;  %v41_v9 = vld [vmem:[%s597_s0 + $0x60] sm:$0xff]  ;;  %v40_v12 = vld [vmem:[%s597_s0 + $0x58] sm:$0xff] }
   0x8   :  { %346 = vmatpush.xpose.msk.msra.mxu3 %vm105_vm0, %v76_v6  ;;  %321 = vmatpush.xpose.msk.msra.mxu0 %vm105_vm0, %v76_v6  ;;  %v57_v11 = vmul.f32 0.5, %v41_v9  ;;  %v56_v14 = vmul.f32 0.5, %v40_v12  ;;  %v39_v15 = vld [vmem:[%s597_s0 + $0x50] sm:$0xff]  ;;  %v38_v18 = vld [vmem:[%s597_s0 + $0x48] sm:$0xff]  ;;  %v37_v21 = vld [vmem:[%s597_s0 + $0x40] sm:$0xff]  ;;  %v409_v42 = vmov 0  }
   0x9   :  { %v74_v10 = vadd.f32 -0.25, %v58_v8  ;;  %v55_v17 = vmul.f32 0.5, %v39_v15  ;;  %v54_v20 = vmul.f32 0.5, %v38_v18  ;;  %v53_v23 = vmul.f32 0.5, %v37_v21  ;;  %v36_v24 = vld [vmem:[%s597_s0 + $0x38] sm:$0xff]  ;;  %v35_v27 = vld [vmem:[%s597_s0 + $0x30] sm:$0xff]  ;;  %364 = vset.pattern.permute.xlu0 %v409_v42  ;;  %365 = vset.pattern.permute.xlu1 %v409_v42 }
   0xa   :  { %v73_v13 = vadd.f32 -0.25, %v57_v11  ;;  %v72_v16 = vadd.f32 -0.25, %v56_v14  ;;  %v52_v26 = vmul.f32 0.5, %v36_v24  ;;  %v51_v29 = vmul.f32 0.5, %v35_v27  ;;  %v34_v30 = vld [vmem:[%s597_s0 + $0x28] sm:$0xff]  ;;  %v33_v33 = vld [vmem:[%s597_s0 + $0x20] sm:$0xff]  ;;  %366 = vset.pattern.permute.xlu2 %v409_v42 }
   0xb   :  { %v71_v19 = vadd.f32 -0.25, %v55_v17  ;;  %v70_v22 = vadd.f32 -0.25, %v54_v20  ;;  %v69_v25 = vadd.f32 -0.25, %v53_v23  ;;  %v50_v32 = vmul.f32 0.5, %v34_v30  ;;  %v32_v36 = vld [vmem:[%s597_s0 + $0x18] sm:$0xff]  ;;  %v82_v38 = vld [vmem:[%s599_s2 + $0x8] sm:$0xff] }
   0xc   :  { %347 = vmatpush.xpose.msk.msra.mxu3 %vm105_vm0, %v75_v7  ;;  %322 = vmatpush.xpose.msk.msra.mxu0 %vm105_vm0, %v75_v7  ;;  %v68_v28 = vadd.f32 -0.25, %v52_v26  ;;  %v67_v31 = vadd.f32 -0.25, %v51_v29  ;;  %v49_v35 = vmul.f32 0.5, %v33_v33  ;;  %v84_v37 = vld [vmem:[%s599_s2 + $0x18] sm:$0xff]  ;;  %v48_v40 = vmul.f32 0.5, %v32_v36  ;;  %v31_v41 = vld [vmem:[%s597_s0 + $0x10] sm:$0xff] }
   0xd   :  { %v66_v34 = vadd.f32 -0.25, %v50_v32  ;;  %102 = vperm.xlu0 %364, %v84_v37   ;;  %92 = vperm.xlu1 %365, %v82_v38   ;;  %v47_v44 = vmul.f32 0.5, %v31_v41  ;;  %v30_v45 = vld [vmem:[%s597_s0 + $0x8] sm:$0xff]  ;;  %v83_v46 = vld [vmem:[%s599_s2 + $0x10] sm:$0xff]  ;;  %v81_v47 = vld [vmem:[%s599_s2] sm:$0xff]  ;;  %vm227_vm1 = vcmask 261120  }
   0xe   :  { %v65_v39 = vadd.f32 -0.25, %v49_v35  ;;  %v64_v43 = vadd.f32 -0.25, %v48_v40  ;;  %v46_v49 = vmul.f32 0.5, %v30_v45  ;;  %v29_v50 = vld [vmem:[%s597_s0] sm:$0xff]  ;;  %v204_v53 = vld [vmem:[%s601_s4 + $0x8] sm:$0xff]  ;;  %v79_v58 = vld [vmem:[%s598_s1 + $0x10] sm:$0xff] }
   0xf   :  { %v63_v48 = vadd.f32 -0.25, %v47_v44  ;;  %v45_v52 = vmul.f32 0.5, %v29_v50  ;;  %v203_v54 = vld [vmem:[%s601_s4] sm:$0xff]  ;;  %v78_v56 = vld [vmem:[%s598_s1 + $0x8] sm:$0xff]  ;;  %v80_v59 = vld [vmem:[%s598_s1 + $0x18] sm:$0xff]  ;;  %s410_s15 = smov [#allocation3]  }
  0x10   :  { %348 = vmatpush.xpose.msk.msra.mxu3 %vm105_vm0, %v74_v10  ;;  %323 = vmatpush.xpose.msk.msra.mxu0 %vm105_vm0, %v74_v10  ;;  %v62_v51 = vadd.f32 -0.25, %v46_v49  ;;  %v77_v57 = vld [vmem:[%s598_s1] sm:$0xff]  ;;  %v206_v9 = vld [vmem:[%s601_s4 + $0x18] sm:$0xff]  ;;  %v205_v14 = vld [vmem:[%s601_s4 + $0x10] sm:$0xff]  ;;  %s310_s16 = sshll.u32 %s410_s15, 4  ;;  %s312_s2 = sshll.u32 %s604_s7, 4  ;;  %s311_s16 = int_to_ptr.vmem [resolvable:$true] %s310_s16  ;;  %s313_s2 = int_to_ptr.hbm [resolvable:$true] %s312_s2 }
  0x11   :  { %v61_v55 = vadd.f32 -0.25, %v45_v52  ;;  %224 = vperm.xlu2 %366, %v206_v9   ;;  %v199_v12 = vld [vmem:[%s600_s3] sm:$0xff]  ;;  %v200_v15 = vld [vmem:[%s600_s3 + $0x8] sm:$0xff]  ;;  %v201_v17 = vld [vmem:[%s600_s3 + $0x10] sm:$0xff] }
  0x12   :  { %v202_v18 = vld [vmem:[%s600_s3 + $0x18] sm:$0xff] }
  0x14   :  { %349 = vmatpush.xpose.msk.msra.mxu3 %vm105_vm0, %v73_v13  ;;  %324 = vmatpush.xpose.msk.msra.mxu0 %vm105_vm0, %v73_v13 }
  0x15   :  { %97 = vperm.xlu0 %364, %v83_v46   ;;  %87 = vperm.xlu1 %365, %v81_v47  }
  0x18   :  { %350 = vmatpush.xpose.msk.msra.mxu3 %vm105_vm0, %v72_v16  ;;  %325 = vmatpush.xpose.msk.msra.mxu0 %vm105_vm0, %v72_v16  ;;  %v274_v16 = vld [vmem:[#allocation2] sm:$0x1] }
  0x19   :  { %219 = vperm.xlu2 %366, %v205_v14  }
  0x1c   :  { %351 = vmatpush.xpose.msk.msra.mxu3 %vm105_vm0, %v71_v19  ;;  %326 = vmatpush.xpose.msk.msra.mxu0 %vm105_vm0, %v71_v19 }
  0x1d   :  { %214 = vperm.xlu0 %364, %v204_v53   ;;  %209 = vperm.xlu1 %365, %v203_v54  }
  0x20   :  { %352 = vmatpush.xpose.msk.msra.mxu3 %vm105_vm0, %v70_v22  ;;  %327 = vmatpush.xpose.msk.msra.mxu0 %vm105_vm0, %v70_v22 }
  0x21   :  { %277 = vperm.xlu2 %366, %v274_v16  }
  0x24   :  { %353 = vmatpush.xpose.msk.msra.mxu3 %vm105_vm0, %v69_v25  ;;  %328 = vmatpush.xpose.msk.msra.mxu0 %vm105_vm0, %v69_v25 }
  0x28   :  { %354 = vmatpush.xpose.msk.msra.mxu3 %vm105_vm0, %v68_v28  ;;  %329 = vmatpush.xpose.msk.msra.mxu0 %vm105_vm0, %v68_v28 }
  0x2c   :  { %355 = vmatpush.xpose.msk.msra.mxu3 %vm105_vm0, %v67_v31  ;;  %330 = vmatpush.xpose.msk.msra.mxu0 %vm105_vm0, %v67_v31 }
  0x30   :  { %356 = vmatpush.xpose.msk.msra.mxu3 %vm105_vm0, %v66_v34  ;;  %331 = vmatpush.xpose.msk.msra.mxu0 %vm105_vm0, %v66_v34  ;;  %v273_v34 = vld [vmem:[%s602_s5] sm:$0x1] }
  0x34   :  { %357 = vmatpush.xpose.msk.msra.mxu3 %vm105_vm0, %v65_v39  ;;  %332 = vmatpush.xpose.msk.msra.mxu0 %vm105_vm0, %v65_v39 }
  0x38   :  { %358 = vmatpush.xpose.msk.msra.mxu3 %vm105_vm0, %v64_v43  ;;  %333 = vmatpush.xpose.msk.msra.mxu0 %vm105_vm0, %v64_v43 }
  0x3c   :  { %359 = vmatpush.xpose.msk.msra.mxu3 %vm105_vm0, %v63_v48  ;;  %334 = vmatpush.xpose.msk.msra.mxu0 %vm105_vm0, %v63_v48 }
  0x40   :  { %360 = vmatpush.xpose.msk.msra.mxu3 %vm105_vm0, %v62_v51  ;;  %335 = vmatpush.xpose.msk.msra.mxu0 %vm105_vm0, %v62_v51 }
  0x44   :  { %361 = vmatpush.xpose.msk.msra.mxu3 %vm105_vm0, %v61_v55  ;;  %336 = vmatpush.xpose.msk.msra.mxu0 %vm105_vm0, %v61_v55 }
  0x47   :  { %338 = vmatmul.msk.f32.vlgmr.msra.gmra.mxu3 %vm105_vm0, %v78_v56  ;;  %337 = vmatmul.msk.f32.vlgmr.msra.gmra.mxu0 %vm105_vm0, %v77_v57 }
  0x4f   :  { %339 = vmatmul.msk.f32.gmra.mxu3 %vm105_vm0, %v79_v58 }
  0x57   :  { %340 = vmatmul.msk.f32.gmra.mxu3 %vm105_vm0, %v80_v59 }
  0x6b   :  { %v225_v21 = vpop.permute.xlu2 %224 }
  0x73   :  { %v220_v23 = vpop.permute.xlu2 %219 }
  0x7b   :  { %v278_v36 = vpop.permute.xlu2 %277 }
  0x7c   :  { %v280_v37 = vperm.slane %v278_v36, 0 }
  0x7f   :  { %v103_v61 = vpop.permute.xlu0 %102  ;;  %v93_v63 = vpop.permute.xlu1 %92 }
  0x87   :  { %v98_v0 = vpop.permute.xlu0 %97  ;;  %v88_v6 = vpop.permute.xlu1 %87 }
  0x8f   :  { %v215_v27 = vpop.permute.xlu0 %214  ;;  %v210_v29 = vpop.permute.xlu1 %209 }
  0xc4   :  { %v183_v4 = vpop.f32.mrf.mxu0 }
  0xc5   :  { %v184_v7 = vadd.f32 %v183_v4, %v88_v6 }
  0xca   :  { %v186_v60 = vpop.f32.mrf.mxu3 }
  0xcb   :  { %v187_v5 = vadd.f32 %v186_v60, %v93_v63 }
  0xd2   :  { %v189_v62 = vpop.f32.mrf.mxu3 }
  0xd3   :  { %v190_v2 = vadd.f32 %v189_v62, %v98_v0 }
  0xda   :  { %v192_v1 = vpop.f32.mrf.mxu3 }
  0xdb   :  { %v193_v3 = vadd.f32 %v192_v1, %v103_v61 }
  0xdd   :  { %367 = vtanh.f32 %v193_v3 }
  0xde   :  { %369 = vtanh.f32 %v190_v2 }
  0xdf   :  { %371 = vtanh.f32 %v187_v5 }
  0xe0   :  { %373 = vtanh.f32 %v184_v7 }
  0xe3   :  { %v368_v8 = vpop.eup %367 }
  0xe4   :  { %252 = vmatpush.msra.mxu1 %v368_v8  ;;  %v370_v10 = vpop.eup %369 }
  0xe5   :  { %v372_v11 = vpop.eup %371 }
  0xe6   :  { %253 = vmatpush.msra.mxu1 %v370_v10  ;;  %v374_v13 = vpop.eup %373 }
  0xe8   :  { %254 = vmatpush.msra.mxu1 %v372_v11 }
  0xea   :  { %255 = vmatpush.msra.mxu1 %v374_v13 }
  0xeb   :  { %341 = vmatmul.msk.f32.vlgmr.msra.gmra.mxu1 %vm227_vm1, %v199_v12 }
  0xf3   :  { %342 = vmatmul.msk.f32.gmra.mxu1 %vm227_vm1, %v200_v15 }
  0xfb   :  { %343 = vmatmul.msk.f32.gmra.mxu1 %vm227_vm1, %v201_v17 }
 0x103   :  { %344 = vmatmul.msk.f32.gmra.mxu1 %vm227_vm1, %v202_v18 }
 0x168   :  { %v257_v19 = vpop.f32.mrf.mxu1 }
 0x169   :  { %v258_v30 = vadd.f32 %v257_v19, %v210_v29 }
 0x170   :  { %v260_v20 = vpop.f32.mrf.mxu1 }
 0x171   :  { %v261_v28 = vadd.f32 %v260_v20, %v215_v27 }
 0x178   :  { %v263_v22 = vpop.f32.mrf.mxu1 }
 0x179   :  { %v264_v25 = vadd.f32 %v263_v22, %v220_v23 }
 0x180   :  { %v266_v24 = vpop.f32.mrf.mxu1 }
 0x181   :  { %v267_v26 = vadd.f32 %v266_v24, %v225_v21 }
 0x183   :  { %375 = vtanh.f32 %v267_v26 }
 0x184   :  { %377 = vtanh.f32 %v264_v25 }
 0x185   :  { %379 = vtanh.f32 %v261_v28 }
 0x186   :  { %381 = vtanh.f32 %v258_v30 }
 0x189   :  { %v376_v31 = vpop.eup %375 }
 0x18a   :  { %296 = vmatpush.msra.mxu2 %v376_v31  ;;  %v378_v32 = vpop.eup %377 }
 0x18b   :  { %v380_v33 = vpop.eup %379 }
 0x18c   :  { %297 = vmatpush.msra.mxu2 %v378_v32  ;;  %v382_v35 = vpop.eup %381 }
 0x18e   :  { %298 = vmatpush.msra.mxu2 %v380_v33 }
 0x190   :  { %299 = vmatpush.msra.mxu2 %v382_v35 }
 0x191   :  { %345 = vmatmul.msk.f32.vlgmr.msra.gmra.mxu2 %vm227_vm1, %v273_v34 }
 0x214   :  { %v301_v38 = vpop.f32.mrf.mxu2 }
 0x215   :  { %v302_v39 = vadd.f32 %v301_v38, %v280_v37 }
 0x217   :  { %304 = vst [vmem:[#allocation3] sm:$0x1] %v302_v39 }
 0x218   :  { %315 = dma.vmem_to_hbm [thread:$0]  %s311_s16, 16, %s313_s2, [#allocation4]  }
 0x219   :  { %407 = dma.done.wait [#allocation4], 16  }
 0x21a   :  { %408 = vsyncadd [#allocation4], 4294967280 }
 0x21b   :  { %320 = vsyncpa [#allocation4], 1 }

</bundles_post_ra>
